<compile_context>
chip_gen: v5e
topology: v5e:2x2
jax: 0.10.0
libtpu: 0.0.40
codegen_flags: <defaults>
</compile_context>

<pallas_src>
import functools
import math

import numpy as np
import jax
import jax.numpy as jnp
from jax import lax
from jax.experimental import pallas as pl
from jax.experimental.pallas import tpu as pltpu


# M-tile selection: v5e/v6e (128 MiB VMEM) -> 512-row tiles (~85% of HBM roofline
# measured on v6e); v7x (64 MiB VMEM) -> 256 keeps double-buffered weights +
# activation tiles + f32 accumulators inside the raised scoped limit.
def _default_tile_m():
    try:
        vmem = pltpu.get_tpu_info().vmem_capacity_bytes
        return 512 if vmem >= (100 << 20) else 256
    except Exception:
        return 256


DEFAULT_TILE_M = _default_tile_m()

# Raised scoped-VMEM limit for the weight-resident kernels (stays under v7x's
# 64 MiB physical VMEM, well under v5e/v6e's 128 MiB).
_VMEM_LIMIT = 48 * 1024 * 1024

# TODO(synk): on v7x, additionally single-buffer the constant-index weight/bias/
# gamma/beta operands via pipeline_mode=pl.Buffered(1) on their BlockSpecs
# (index_map is lambda i: (0, 0), so double-buffering them only wastes VMEM).


def _pad_rows(x, m_pad):
    """Pad the leading (row) dim with zeros up to m_pad (no-op if already there)."""
    M = x.shape[0]
    if m_pad == M:
        return x
    pad = [(0, m_pad - M)] + [(0, 0)] * (x.ndim - 1)
    return jnp.pad(x, pad)


def _tile_rows(M, tile_m):
    """Pick an M tile and padded extent: grid = cdiv(M, tm), rows padded to tm*grid."""
    tm = min(tile_m, M)
    g = pl.cdiv(M, tm)
    return tm, g, tm * g


# ----------------------------- Pallas kernels ------------------------------

def _layernorm_kernel(x_ref, g_ref, b_ref, o_ref, *, eps):
    x = x_ref[...].astype(jnp.float32)
    mu = jnp.mean(x, axis=-1, keepdims=True)
    xc = x - mu
    var = jnp.mean(xc * xc, axis=-1, keepdims=True)
    inv = lax.rsqrt(var + eps)
    o_ref[...] = (xc * inv * g_ref[...] + b_ref[...]).astype(o_ref.dtype)


def pallas_layernorm(x, gamma, beta, eps=1e-12, out_dtype=jnp.bfloat16,
                     tile_m=None):
    M, H = x.shape
    tm, g, Mp = _tile_rows(M, tile_m or DEFAULT_TILE_M)
    out = pl.pallas_call(
        functools.partial(_layernorm_kernel, eps=eps),
        out_shape=jax.ShapeDtypeStruct((Mp, H), out_dtype),
        grid=(g,),
        in_specs=[
            pl.BlockSpec((tm, H), lambda i: (i, 0)),
            pl.BlockSpec((1, H), lambda i: (0, 0)),
            pl.BlockSpec((1, H), lambda i: (0, 0)),
        ],
        out_specs=pl.BlockSpec((tm, H), lambda i: (i, 0)),
        compiler_params=pltpu.CompilerParams(
            dimension_semantics=("parallel",),
            vmem_limit_bytes=_VMEM_LIMIT),
    )(_pad_rows(x, Mp), gamma, beta)
    return out if Mp == M else out[:M]


def _ffn_kernel(x_ref, wi_ref, bi_ref, wo_ref, bo_ref, g_ref, beta_ref, o_ref,
                *, eps):
    """Fused FFN: x@W_inter -> GELU -> @W_out -> +bias +residual -> LayerNorm.

    The (tm, I) GELU intermediate stays in VMEM/vregs: no HBM write + re-read
    of the intermediate tensor (saves ~2*M*I*2 bytes of HBM traffic per layer).
    """
    x = x_ref[...]                                                    # (tm, H) bf16
    t = jnp.dot(x, wi_ref[...], preferred_element_type=jnp.float32) + bi_ref[...]
    # TODO(synk): HF BERT uses exact erf-GELU; tanh-approx GELU is used here for
    # guaranteed Mosaic lowering of the transcendental.
    t = jax.nn.gelu(t, approximate=True).astype(wo_ref.dtype)        # (tm, I) bf16
    y = jnp.dot(t, wo_ref[...], preferred_element_type=jnp.float32)  # (tm, H) f32
    y = y + bo_ref[...] + x.astype(jnp.float32)                      # bias + residual
    mu = jnp.mean(y, axis=-1, keepdims=True)
    yc = y - mu
    var = jnp.mean(yc * yc, axis=-1, keepdims=True)
    inv = lax.rsqrt(var + eps)
    o_ref[...] = (yc * inv * g_ref[...] + beta_ref[...]).astype(o_ref.dtype)


def pallas_ffn_res_ln(x, wi, bi, wo, bo, gamma, beta, eps=1e-12,
                      out_dtype=jnp.bfloat16, tile_m=None):
    """x [M,H] bf16 -> LN(x + (GELU(x@wi+bi))@wo + bo), one fused kernel, M-tiled."""
    M, H = x.shape
    I = wi.shape[1]
    tm, g, Mp = _tile_rows(M, tile_m or DEFAULT_TILE_M)
    out = pl.pallas_call(
        functools.partial(_ffn_kernel, eps=eps),
        out_shape=jax.ShapeDtypeStruct((Mp, H), out_dtype),
        grid=(g,),
        in_specs=[
            pl.BlockSpec((tm, H), lambda i: (i, 0)),
            pl.BlockSpec((H, I), lambda i: (0, 0)),
            pl.BlockSpec((1, I), lambda i: (0, 0)),
            pl.BlockSpec((I, H), lambda i: (0, 0)),
            pl.BlockSpec((1, H), lambda i: (0, 0)),
            pl.BlockSpec((1, H), lambda i: (0, 0)),
            pl.BlockSpec((1, H), lambda i: (0, 0)),
        ],
        out_specs=pl.BlockSpec((tm, H), lambda i: (i, 0)),
        compiler_params=pltpu.CompilerParams(
            dimension_semantics=("parallel",),
            vmem_limit_bytes=_VMEM_LIMIT),
    )(_pad_rows(x, Mp), wi, bi, wo, bo, gamma, beta)
    return out if Mp == M else out[:M]


def _attn_kernel(h_ref, mask_ref, wqkv_ref, bqkv_ref, wo_ref, bo_ref,
                 g_ref, beta_ref, o_ref, *, NH, HD, eps):
    """One batch element: fused QKV proj + attention + out-proj + residual + LN.

    The 1/sqrt(HD) score scale is pre-folded into the Q columns of wqkv/bqkv
    (prepare_params), so the kernel does no per-score VPU multiply.
    """
    H = NH * HD
    hx = h_ref[0]                                      # (S, H) bf16
    mask = mask_ref[0]                                 # (1, S) f32 additive key mask
    # Fused QKV projection: W_qkv stays resident; the (S, 3H) qkv tensor never
    # leaves VMEM (no HBM round-trip between projection and attention).
    qkv = (jnp.dot(hx, wqkv_ref[...], preferred_element_type=jnp.float32)
           + bqkv_ref[...]).astype(hx.dtype)           # (S, 3H) bf16
    # TODO(synk): for large NH / long S, switch the static head loop to a head
    # grid axis (or lax.fori_loop) and tile the query dim flash-style so (S,S)
    # f32 score temporaries have bounded live ranges.
    ctxs = []
    for hi in range(NH):                               # NH is a small static constant
        qh = qkv[:, hi * HD:(hi + 1) * HD]             # (S, HD) — Q already scaled
        kh = qkv[:, H + hi * HD:H + (hi + 1) * HD]
        vh = qkv[:, 2 * H + hi * HD:2 * H + (hi + 1) * HD]
        # contract head_dim of both operands directly (no kh.T relayout)
        s = lax.dot_general(qh, kh, (((1,), (1,)), ((), ())),
                            preferred_element_type=jnp.float32)       # (S, S)
        s = s + mask
        s = s - jnp.max(s, axis=-1, keepdims=True)
        p = jnp.exp(s)
        p = p * pl.reciprocal(jnp.sum(p, axis=-1, keepdims=True), approx=True)
        ctxs.append(jnp.dot(p.astype(vh.dtype), vh,
                            preferred_element_type=jnp.float32).astype(hx.dtype))
    ctx = jnp.concatenate(ctxs, axis=-1)               # (S, H) bf16 — all heads
    # Single deep-K (K=H) output projection instead of NH shallow K=HD matmuls
    # (2-4x better MXU utilization), then bias + residual + LayerNorm epilogue.
    y = jnp.dot(ctx, wo_ref[...], preferred_element_type=jnp.float32)
    y = y + bo_ref[...] + hx.astype(jnp.float32)
    mu = jnp.mean(y, axis=-1, keepdims=True)
    yc = y - mu
    var = jnp.mean(yc * yc, axis=-1, keepdims=True)
    inv = lax.rsqrt(var + eps)
    o_ref[0] = (yc * inv * g_ref[...] + beta_ref[...]).astype(o_ref.dtype)


def pallas_attn_block(h, add_mask, wqkv, bqkv, wo, bo, gamma, beta, *, NH, HD,
                      eps=1e-12):
    """h [B,S,H] bf16, add_mask [B,1,S] f32 -> [B,S,H] bf16 (attn sub-layer output)."""
    B, S, H = h.shape
    return pl.pallas_call(
        functools.partial(_attn_kernel, NH=NH, HD=HD, eps=eps),
        out_shape=jax.ShapeDtypeStruct((B, S, H), jnp.bfloat16),
        grid=(B,),
        in_specs=[
            pl.BlockSpec((1, S, H), lambda b: (b, 0, 0)),
            pl.BlockSpec((1, 1, S), lambda b: (b, 0, 0)),
            pl.BlockSpec((H, 3 * H), lambda b: (0, 0)),
            pl.BlockSpec((1, 3 * H), lambda b: (0, 0)),
            pl.BlockSpec((H, H), lambda b: (0, 0)),
            pl.BlockSpec((1, H), lambda b: (0, 0)),
            pl.BlockSpec((1, H), lambda b: (0, 0)),
            pl.BlockSpec((1, H), lambda b: (0, 0)),
        ],
        out_specs=pl.BlockSpec((1, S, H), lambda b: (b, 0, 0)),
        compiler_params=pltpu.CompilerParams(
            dimension_semantics=("parallel",),
            vmem_limit_bytes=_VMEM_LIMIT),
    )(h, add_mask, wqkv, bqkv, wo, bo, gamma, beta)


def _pool_kernel(h_ref, m_ref, wp_ref, bp_ref, o_ref):
    """Fused center-position max pool + tanh pooler for one batch element."""
    hid = h_ref[0].astype(jnp.float32)                 # (S, H)
    m = m_ref[0]                                       # (S, 1)
    # TODO(synk): rows with an all-zero center mask yield -1e30 here; the torch
    # reference indexes only selected positions (and would error on an empty list).
    masked = jnp.where(m > 0.5, hid, jnp.full_like(hid, -1e30))
    cmax = jnp.max(masked, axis=0, keepdims=True)      # (1, H)
    cls = hid[0:1, :].astype(wp_ref.dtype)             # (1, H) bf16
    pooled = jnp.tanh(
        jnp.dot(cls, wp_ref[...], preferred_element_type=jnp.float32) + bp_ref[...])
    o_ref[0] = jnp.concatenate([cmax, pooled], axis=0).astype(o_ref.dtype)


def pallas_pool(hidden, center_mask, wp, bp):
    """hidden [B,S,H] bf16, mask [B,S,1] f32 -> [B,2,H] bf16 ([center_max ; pooled])."""
    B, S, H = hidden.shape
    return pl.pallas_call(
        _pool_kernel,
        out_shape=jax.ShapeDtypeStruct((B, 2, H), jnp.bfloat16),
        grid=(B,),
        in_specs=[
            pl.BlockSpec((1, S, H), lambda b: (b, 0, 0)),
            pl.BlockSpec((1, S, 1), lambda b: (b, 0, 0)),
            pl.BlockSpec((H, H), lambda b: (0, 0)),
            pl.BlockSpec((1, H), lambda b: (0, 0)),
        ],
        out_specs=pl.BlockSpec((1, 2, H), lambda b: (b, 0, 0)),
        compiler_params=pltpu.CompilerParams(dimension_semantics=("parallel",)),
    )(hidden, center_mask, wp, bp)


def _mlp_kernel(*refs, acts):
    """Fused classifier head: chain of (matmul + bias + optional relu)."""
    x_ref = refs[0]
    o_ref = refs[-1]
    n = len(acts)
    x = x_ref[...]
    for i, act in enumerate(acts):
        w = refs[1 + 2 * i][...]
        b = refs[2 + 2 * i][...]
        y = jnp.dot(x, w, preferred_element_type=jnp.float32) + b
        if act == "relu":
            y = jnp.maximum(y, 0.0)
        x = y.astype(w.dtype) if i + 1 < n else y
    o_ref[...] = x.astype(o_ref.dtype)


def pallas_mlp(x, stages, out_dtype=jnp.float32):
    """stages = [(w [K,N] bf16, b [1,N] f32, act), ...]; all fused in one kernel."""
    M = x.shape[0]
    N_out = stages[-1][0].shape[1]
    acts = tuple(a for _, _, a in stages)
    in_specs = [pl.BlockSpec(x.shape, lambda i: (0, 0))]
    args = [x]
    for w, b, _ in stages:
        in_specs.append(pl.BlockSpec(w.shape, lambda i: (0, 0)))
        in_specs.append(pl.BlockSpec(b.shape, lambda i: (0, 0)))
        args += [w, b]
    return pl.pallas_call(
        functools.partial(_mlp_kernel, acts=acts),
        out_shape=jax.ShapeDtypeStruct((M, N_out), out_dtype),
        grid=(1,),
        in_specs=in_specs,
        out_specs=pl.BlockSpec((M, N_out), lambda i: (0, 0)),
    )(*args)


# --------------------------- Synthetic BERT model --------------------------

def init_params(key, *, vocab, max_pos, H, NH, I, L, cls_hidden, nclasses):
    keys = iter(jax.random.split(key, 16 + 8 * L))

    def dense(n_in, n_out):
        w = jax.random.normal(next(keys), (n_in, n_out), jnp.float32) * 0.02
        b = jnp.zeros((n_out,), jnp.float32)
        return {"w": w, "b": b}

    p = {
        "word_emb": jax.random.normal(next(keys), (vocab, H), jnp.float32) * 0.02,
        "pos_emb": jax.random.normal(next(keys), (max_pos, H), jnp.float32) * 0.02,
        "type_emb": jax.random.normal(next(keys), (2, H), jnp.float32) * 0.02,
        "emb_ln_g": jnp.ones((H,), jnp.float32),
        "emb_ln_b": jnp.zeros((H,), jnp.float32),
        "layers": [],
        "pooler": dense(H, H),
        "fc1": dense(H * 2, cls_hidden),
        "fc2": dense(cls_hidden, cls_hidden // 2),
        "fc3": dense(cls_hidden // 2, cls_hidden // 2),   # unused (fc3=False)
        "fc4": dense(cls_hidden // 2, nclasses),
    }
    for _ in range(L):
        p["layers"].append({
            "q": dense(H, H), "k": dense(H, H), "v": dense(H, H),
            "attn_out": dense(H, H),
            "ln1_g": jnp.ones((H,), jnp.float32), "ln1_b": jnp.zeros((H,), jnp.float32),
            "inter": dense(H, I),
            "out": dense(I, H),
            "ln2_g": jnp.ones((H,), jnp.float32), "ln2_b": jnp.zeros((H,), jnp.float32),
        })
    return p


def prepare_params(p, head_dim):
    """One-time prep: bf16 weights for the MXU, fused QKV weights with the
    1/sqrt(HD) attention scale folded into the Q columns, (1,N) f32 biases and
    LN params (no per-call reshape/astype/scale in the wrappers or kernels)."""
    bf = jnp.bfloat16
    scale = 1.0 / math.sqrt(head_dim)

    def w2(d):
        return d["w"].astype(bf)

    def b2(d):
        return d["b"].reshape(1, -1).astype(jnp.float32)

    prep = {
        "word_emb": p["word_emb"], "pos_emb": p["pos_emb"], "type_emb": p["type_emb"],
        "emb_ln_g": p["emb_ln_g"].reshape(1, -1), "emb_ln_b": p["emb_ln_b"].reshape(1, -1),
        "pooler_w": w2(p["pooler"]), "pooler_b": b2(p["pooler"]),
        "fc1_w": w2(p["fc1"]), "fc1_b": b2(p["fc1"]),
        "fc2_w": w2(p["fc2"]), "fc2_b": b2(p["fc2"]),
        "fc3_w": w2(p["fc3"]), "fc3_b": b2(p["fc3"]),
        "fc4_w": w2(p["fc4"]), "fc4_b": b2(p["fc4"]),
        "layers": [],
    }
    for lp in p["layers"]:
        qkv_w = jnp.concatenate(
            [lp["q"]["w"] * scale, lp["k"]["w"], lp["v"]["w"]], axis=1).astype(bf)
        qkv_b = jnp.concatenate(
            [lp["q"]["b"] * scale, lp["k"]["b"], lp["v"]["b"]]
        ).reshape(1, -1).astype(jnp.float32)
        prep["layers"].append({
            "qkv_w": qkv_w,
            "qkv_b": qkv_b,
            "attn_out_w": lp["attn_out"]["w"].astype(bf),
            "attn_out_b": b2(lp["attn_out"]),
            "ln1_g": lp["ln1_g"].reshape(1, -1), "ln1_b": lp["ln1_b"].reshape(1, -1),
            "inter_w": w2(lp["inter"]), "inter_b": b2(lp["inter"]),
            "out_w": w2(lp["out"]), "out_b": b2(lp["out"]),
            "ln2_g": lp["ln2_g"].reshape(1, -1), "ln2_b": lp["ln2_b"].reshape(1, -1),
        })
    return prep


def bert_layer(h, lp, add_mask, NH, HD):
    B, S, H = h.shape
    # attention sub-layer: QKV proj + attention + out-proj + residual + LN (1 kernel)
    h1 = pallas_attn_block(h, add_mask,
                           lp["qkv_w"], lp["qkv_b"],
                           lp["attn_out_w"], lp["attn_out_b"],
                           lp["ln1_g"], lp["ln1_b"],
                           NH=NH, HD=HD)                              # [B, S, H] bf16
    h1_2d = h1.reshape(B * S, H)
    # FFN sub-layer: inter + GELU + out + residual + LN (1 kernel, no HBM intermediate)
    h2 = pallas_ffn_res_ln(h1_2d,
                           lp["inter_w"], lp["inter_b"],
                           lp["out_w"], lp["out_b"],
                           lp["ln2_g"], lp["ln2_b"])                  # [B*S, H] bf16
    return h2.reshape(B, S, H)


def bert_for_meta_annotation_forward(prep, input_ids, attention_mask,
                                     center_mask, *, NH, HD, fc2_enabled=True,
                                     fc3_enabled=False):
    B, S = input_ids.shape
    H = NH * HD

    # ---- embeddings (gather is plain-JAX glue) ----
    pos_ids = jnp.arange(S, dtype=jnp.int32)
    emb = (jnp.take(prep["word_emb"], input_ids, axis=0)
           + jnp.take(prep["pos_emb"], pos_ids, axis=0)[None, :, :]
           + prep["type_emb"][0][None, None, :])
    h = pallas_layernorm(emb.reshape(B * S, H),
                         prep["emb_ln_g"], prep["emb_ln_b"]).reshape(B, S, H)
    # embedding dropout: identity in eval

    add_mask = ((1.0 - attention_mask.astype(jnp.float32)) * -10000.0
                ).reshape(B, 1, S)

    # ---- encoder ----
    for lp in prep["layers"]:
        h = bert_layer(h, lp, add_mask, NH, HD)
    last_hidden = h                                           # [B, S, H] bf16

    # ---- fused center-position max pool + tanh pooler -> [B, 2H] ----
    feats = pallas_pool(last_hidden, center_mask,
                        prep["pooler_w"], prep["pooler_b"]).reshape(B, 2 * H)

    # ---- classifier head (dropouts are identity in eval), one fused kernel ----
    stages = [(prep["fc1_w"], prep["fc1_b"], "relu")]
    if fc2_enabled:
        stages.append((prep["fc2_w"], prep["fc2_b"], "relu"))
        if fc3_enabled:
            stages.append((prep["fc3_w"], prep["fc3_b"], "relu"))
    stages.append((prep["fc4_w"], prep["fc4_b"], None))
    logits = pallas_mlp(feats, stages)                        # [B, nclasses] f32
    # NOTE: the PyTorch forward returns raw fc4 output (LogSoftmax unused).
    return logits


# ---------------------------------- main ------------------------------------

if __name__ == "__main__":
    # Small, BERT-consistent config.
    B, S = 2, 8
    H, NH = 32, 2
    HD = H // NH
    I = 64
    L = 2
    VOCAB, MAX_POS = 50, 16
    CLS_HIDDEN = 64          # config.model.hidden_size
    NCLASSES = 3             # config.model.nclasses
    # model_architecture_config: {'fc2': True, 'fc3': False}

    key = jax.random.PRNGKey(0)
    k_param, k_ids = jax.random.split(key)

    params = init_params(k_param, vocab=VOCAB, max_pos=MAX_POS, H=H, NH=NH,
                         I=I, L=L, cls_hidden=CLS_HIDDEN, nclasses=NCLASSES)
    prep = prepare_params(params, HD)

    input_ids = jax.random.randint(k_ids, (B, S), 0, VOCAB, dtype=jnp.int32)
    attention_mask = np.ones((B, S), dtype=np.float32)
    attention_mask[1, 6:] = 0.0                               # some padding
    attention_mask = jnp.asarray(attention_mask)

    # center_positions = [[1, 3], [2, 4, 5]]  -> one-hot membership mask [B, S, 1]
    center_positions = [[1, 3], [2, 4, 5]]
    cmask = np.zeros((B, S, 1), dtype=np.float32)
    for i, idxs in enumerate(center_positions):
        for j in idxs:
            cmask[i, j, 0] = 1.0
    center_mask = jnp.asarray(cmask)

    logits = bert_for_meta_annotation_forward(
        prep, input_ids, attention_mask, center_mask,
        NH=NH, HD=HD, fc2_enabled=True, fc3_enabled=False)
    logits = jax.block_until_ready(logits)

    assert logits.shape == (B, NCLASSES)
    assert bool(jnp.all(jnp.isfinite(logits)))
    print("KERNEL_OK")
</pallas_src>

<mosaic_0001>
module attributes {stable_mosaic.version = 11 : i64} {
  func.func @_layernorm_kernel(%arg0: i32, %arg1: memref<16x32xf32, #tpu.memory_space<vmem>>, %arg2: memref<1x32xf32, #tpu.memory_space<vmem>>, %arg3: memref<1x32xf32, #tpu.memory_space<vmem>>, %arg4: memref<16x32xbf16, #tpu.memory_space<vmem>>) attributes {dimension_semantics = [#tpu.dimension_semantics<parallel>], iteration_bounds = array<i64: 1>, scalar_prefetch = 0 : i64, scratch_operands = 0 : i64, tpu.core_type = #tpu.core_type<tc>, window_params = [{transform_indices = @transform_0, window_bounds = array<i64: 16, 32>}, {pipeline_mode = #tpu.pipeline_mode<synchronous>, transform_indices = @transform_1, window_bounds = array<i64: 1, 32>}, {pipeline_mode = #tpu.pipeline_mode<synchronous>, transform_indices = @transform_2, window_bounds = array<i64: 1, 32>}, {transform_indices = @transform_3, window_bounds = array<i64: 16, 32>}]} {
    %c0 = arith.constant 0 : index
    %c0_0 = arith.constant 0 : index
    %0 = vector.load %arg1[%c0, %c0_0] : memref<16x32xf32, #tpu.memory_space<vmem>>, vector<16x32xf32>
    %cst = arith.constant dense<0.000000e+00> : vector<16xf32>
    %1 = vector.multi_reduction <add>, %0, %cst [1] : vector<16x32xf32> to vector<16xf32>
    %2 = vector.shape_cast %1 : vector<16xf32> to vector<16x1xf32>
    %cst_1 = arith.constant 3.200000e+01 : f32
    %3 = vector.broadcast %cst_1 : f32 to vector<16x1xf32>
    %4 = arith.divf %2, %3 : vector<16x1xf32>
    %5 = vector.broadcast %4 : vector<16x1xf32> to vector<16x32xf32>
    %6 = arith.subf %0, %5 : vector<16x32xf32>
    %7 = arith.mulf %6, %6 : vector<16x32xf32>
    %cst_2 = arith.constant dense<0.000000e+00> : vector<16xf32>
    %8 = vector.multi_reduction <add>, %7, %cst_2 [1] : vector<16x32xf32> to vector<16xf32>
    %9 = vector.shape_cast %8 : vector<16xf32> to vector<16x1xf32>
    %cst_3 = arith.constant 3.200000e+01 : f32
    %10 = vector.broadcast %cst_3 : f32 to vector<16x1xf32>
    %11 = arith.divf %9, %10 : vector<16x1xf32>
    %cst_4 = arith.constant 9.99999996E-13 : f32
    %12 = vector.broadcast %cst_4 : f32 to vector<16x1xf32>
    %13 = arith.addf %11, %12 : vector<16x1xf32>
    %14 = math.rsqrt %13 : vector<16x1xf32>
    %15 = vector.broadcast %14 : vector<16x1xf32> to vector<16x32xf32>
    %16 = arith.mulf %6, %15 : vector<16x32xf32>
    %c0_5 = arith.constant 0 : index
    %c0_6 = arith.constant 0 : index
    %17 = vector.load %arg2[%c0_5, %c0_6] : memref<1x32xf32, #tpu.memory_space<vmem>>, vector<1x32xf32>
    %18 = vector.broadcast %17 : vector<1x32xf32> to vector<16x32xf32>
    %19 = arith.mulf %16, %18 : vector<16x32xf32>
    %c0_7 = arith.constant 0 : index
    %c0_8 = arith.constant 0 : index
    %20 = vector.load %arg3[%c0_7, %c0_8] : memref<1x32xf32, #tpu.memory_space<vmem>>, vector<1x32xf32>
    %21 = vector.broadcast %20 : vector<1x32xf32> to vector<16x32xf32>
    %22 = arith.addf %19, %21 : vector<16x32xf32>
    %23 = arith.truncf %22 : vector<16x32xf32> to vector<16x32xbf16>
    %c0_9 = arith.constant 0 : index
    %c0_10 = arith.constant 0 : index
    %24 = vector.load %arg4[%c0_9, %c0_10] : memref<16x32xbf16, #tpu.memory_space<vmem>>, vector<16x32xbf16>
    tpu.vector_store %arg4[%c0_9, %c0_10], %23 {strides = array<i32>} : memref<16x32xbf16, #tpu.memory_space<vmem>>, vector<16x32xbf16>,
    return
  }
  func.func @transform_0(%arg0: i32) -> (i32, i32) {
    %c0_i32 = arith.constant 0 : i32
    %c0_i32_0 = arith.constant 0 : i32
    return %arg0, %c0_i32 : i32, i32
  }
  func.func @transform_1(%arg0: i32) -> (i32, i32) {
    %c0_i32 = arith.constant 0 : i32
    %c0_i32_0 = arith.constant 0 : i32
    %c0_i32_1 = arith.constant 0 : i32
    return %c0_i32, %c0_i32_0 : i32, i32
  }
  func.func @transform_2(%arg0: i32) -> (i32, i32) {
    %c0_i32 = arith.constant 0 : i32
    %c0_i32_0 = arith.constant 0 : i32
    %c0_i32_1 = arith.constant 0 : i32
    return %c0_i32, %c0_i32_0 : i32, i32
  }
  func.func @transform_3(%arg0: i32) -> (i32, i32) {
    %c0_i32 = arith.constant 0 : i32
    %c0_i32_0 = arith.constant 0 : i32
    return %arg0, %c0_i32 : i32, i32
  }
}

</mosaic_0001>

<bundles_post_ra>
// kernel: tpu_custom_call.1
= control target key start
LH: loop header
LB: loop body
LE: loop exit
PB: predicated region body
PF: predicated region fallthrough
CT: control target
= control target key end

     0   :  { %8 = vsyncpa [#allocation3], 0  ;;  %s274_s0 = inlined_call_operand.hbm [shape: f32[16,32], index: 0, kind: input, shape index: {}]   ;;  %s275_s1 = inlined_call_operand.hbm [shape: f32[1,32], index: 1, kind: input, shape index: {}]   ;;  %s276_s2 = inlined_call_operand.vmem [shape: f32[1,32], index: 2, kind: input, shape index: {}]   ;;  %s277_s3 = inlined_call_operand.hbm [shape: bf16[16,32], index: 3, kind: output, shape index: {}]  }
   0x1   :  { %9 = vsyncpa [#allocation6], 0 }
   0x2   :  { %10 = vsyncpa [#allocation4], 0  ;;  %s15_s14 = sshll.u32 %s274_s0, 4  ;;  %s230_s15 = smov [#allocation2]   ;;  %s16_s14 = int_to_ptr.hbm [resolvable:$true] %s15_s14 }
   0x3   :  { %s17_s16 = sshll.u32 %s230_s15, 4  ;;  %s29_s19 = sshll.u32 %s275_s1, 4  ;;  %s18_s16 = int_to_ptr.vmem [resolvable:$true] %s17_s16  ;;  %s30_s19 = int_to_ptr.hbm [resolvable:$true] %s29_s19 }
   0x4   :  { %s231_s20 = smov 128   ;;  %s232_s21 = smov 8  }
   0x5   :  { %23 = dma.hbm_to_vmem [thread:$0]  %s16_s14, 256, %s18_s16, [#allocation3], %s231_s20, %s231_s20, %s232_s21  }
   0x6   :  { %s233_s22 = smov [#allocation5]  }
   0x7   :  { %s31_s23 = sshll.u32 %s233_s22, 4  ;;  %s32_s23 = int_to_ptr.vmem [resolvable:$true] %s31_s23 }
   0x8   :  { %34 = dma.hbm_to_vmem [thread:$0]  %s30_s19, 16, %s32_s23, [#allocation6]  }
   0x9   :  { %224 = dma.done.wait [#allocation3], 256  }
   0xa   :  { %225 = vsyncadd [#allocation3], 4294967040 }
   0xb   :  { %226 = dma.done.wait [#allocation6], 16  }
   0xc   :  { %227 = vsyncadd [#allocation6], 4294967280  ;;  %vm47_vm0 = vcmask 261120   ;;  %v45_v0 = vld [vmem:[#allocation2] sm:$0xff]  ;;  %v46_v2 = vld [vmem:[#allocation2 + $0x8] sm:$0xff]  ;;  %v234_v4 = vmov 32.0  }
   0xd   :  { %v48_v1 = vsel %vm47_vm0, %v45_v0, 0.0  ;;  %v51_v3 = vsel %vm47_vm0, %v46_v2, 0.0  ;;  %146 = vrcp.f32 %v234_v4  ;;  %v144_v35 = vld [vmem:[#allocation5] ss:$0 sm:$0xff]  ;;  %v145_v38 = vld [vmem:[%s276_s2] ss:$0 sm:$0xff] }
   0xe   :  { %49 = vadd.xlane.f32.xlu0 %v48_v1  ;;  %vm113_vm7 = vcmask 257024   ;;  %s235_s24 = smov [#allocation7]   ;;  %s122_s2 = sshll.u32 %s277_s3, 4  ;;  %s123_s2 = int_to_ptr.hbm [resolvable:$true] %s122_s2 }
   0xf   :  { %s120_s25 = sshll.u32 %s235_s24, 4  ;;  %s236_s28 = smov 64   ;;  %s121_s25 = int_to_ptr.vmem [resolvable:$true] %s120_s25 }
  0x10   :  { %s237_s29 = smov 4  }
  0x13   :  { %v147_v5 = vpop.eup %146 }
  0x14   :  { %v55_v6 = vmul.f32 32.0, %v147_v5  ;;  %vm59_vm1 = vweird.f32 %v147_v5 }
  0x16   :  { %52 = vadd.xlane.f32.xlu0 %v51_v3  ;;  %v56_v7 = vsub.f32 1.0, %v55_v6 }
  0x18   :  { %v57_v8 = vmul.f32 %v147_v5, %v56_v7 }
  0x1a   :  { %v58_v9 = vadd.f32 %v147_v5, %v57_v8 }
  0x1c   :  { %v60_v10 = vsel %vm59_vm1, %v147_v5, %v58_v9 }
  0x81   :  { %v50_v11 = vpop.xlane.xlu0 %49 }
  0x82   :  { %v61_v12 = vmul.f32 %v60_v10, %v50_v11 }
  0x84   :  { %v63_v13 = vsub.f32 %v45_v0, %v61_v12 }
  0x86   :  { %v65_v14 = vmul.f32 %v63_v13, %v63_v13 }
  0x88   :  { %v67_v15 = vsel %vm47_vm0, %v65_v14, 0.0 }
  0x89   :  { %68 = vadd.xlane.f32.xlu1 %v67_v15  ;;  %v53_v16 = vpop.xlane.xlu0 %52 }
  0x8a   :  { %v62_v17 = vmul.f32 %v60_v10, %v53_v16 }
  0x8c   :  { %v64_v18 = vsub.f32 %v46_v2, %v62_v17 }
  0x8e   :  { %v66_v19 = vmul.f32 %v64_v18, %v64_v18 }
  0x90   :  { %v70_v20 = vsel %vm47_vm0, %v66_v19, 0.0 }
  0x91   :  { %71 = vadd.xlane.f32.xlu1 %v70_v20 }
  0xfc   :  { %v69_v21 = vpop.xlane.xlu1 %68 }
  0xfd   :  { %v73_v22 = vmul.f32 %v69_v21, %v60_v10 }
  0xff   :  { %v75_v23 = vadd.f32 1e-12, %v73_v22 }
 0x101   :  { %148 = vrsqrt.f32 %v75_v23  ;;  %vm83_vm3 = vweird.f32 %v75_v23 }
 0x104   :  { %v72_v24 = vpop.xlane.xlu1 %71 }
 0x105   :  { %v74_v25 = vmul.f32 %v72_v24, %v60_v10 }
 0x107   :  { %v149_v26 = vpop.eup %148  ;;  %v76_v27 = vadd.f32 1e-12, %v74_v25 }
 0x108   :  { %v78_v28 = vmul.f32 %v149_v26, %v75_v23  ;;  %vm84_vm2 = vweird.f32 %v149_v26 }
 0x109   :  { %150 = vrsqrt.f32 %v76_v27  ;;  %vm85_vm4 = vmor %vm83_vm3, %vm84_vm2  ;;  %vm93_vm6 = vweird.f32 %v76_v27 }
 0x10a   :  { %v79_v29 = vmul.f32 %v149_v26, %v78_v28 }
 0x10c   :  { %v80_v30 = vmul.f32 0.5, %v79_v29 }
 0x10e   :  { %v81_v31 = vsub.f32 1.5, %v80_v30 }
 0x10f   :  { %v151_v32 = vpop.eup %150 }
 0x110   :  { %v82_v33 = vmul.f32 %v149_v26, %v81_v31  ;;  %v88_v34 = vmul.f32 %v151_v32, %v76_v27  ;;  %vm94_vm5 = vweird.f32 %v151_v32 }
 0x111   :  { %vm95_vm8 = vmor %vm93_vm6, %vm94_vm5 }
 0x112   :  { %v86_v36 = vsel %vm85_vm4, %v149_v26, %v82_v33  ;;  %v89_v37 = vmul.f32 %v151_v32, %v88_v34 }
 0x113   :  { %v97_v39 = vmul.f32 %v86_v36, %v63_v13 }
 0x114   :  { %v90_v40 = vmul.f32 0.5, %v89_v37 }
 0x115   :  { %v103_v41 = vmul.f32 %v144_v35, %v97_v39 }
 0x116   :  { %v91_v42 = vsub.f32 1.5, %v90_v40 }
 0x117   :  { %v109_v43 = vadd.f32 %v145_v38, %v103_v41 }
 0x118   :  { %v92_v44 = vmul.f32 %v151_v32, %v91_v42 }
 0x119   :  { %v111_v45 = vpack.c.bf16 %v109_v43, %v109_v43 }
 0x11a   :  { %v96_v46 = vsel %vm95_vm8, %v151_v32, %v92_v44 }
 0x11b   :  { %v98_v47 = vmul.f32 %v96_v46, %v64_v18  ;;  %114 = vst.msk [vmem:[#allocation7] sm:$0xf] %vm113_vm7, %v111_v45 }
 0x11d   :  { %v104_v48 = vmul.f32 %v144_v35, %v98_v47 }
 0x11f   :  { %v110_v49 = vadd.f32 %v145_v38, %v104_v48 }
 0x121   :  { %v112_v50 = vpack.c.bf16 %v110_v49, %v110_v49 }
 0x123   :  { %115 = vst.msk [vmem:[#allocation7 + $0x4] sm:$0xf] %vm113_vm7, %v112_v50 }
 0x124   :  { %128 = dma.vmem_to_hbm [thread:$0]  %s121_s25, 128, %s123_s2, [#allocation4], %s236_s28, %s236_s28, %s237_s29  }
 0x125   :  { %228 = dma.done.wait [#allocation4], 128  }
 0x126   :  { %229 = vsyncadd [#allocation4], 4294967168 }
 0x127   :  { %133 = vsyncpa [#allocation3], 1 }
 0x128   :  { %134 = vsyncpa [#allocation6], 1 }
 0x129   :  { %135 = vsyncpa [#allocation4], 1 }

</bundles_post_ra>
